<compile_context>
chip_gen: v6e
topology: v6e:2x2x1
jax: 0.10.0
libtpu: 0.0.40
codegen_flags: <defaults>
</compile_context>

<pallas_src>
import jax
import jax.numpy as jnp
from jax.experimental import pallas as pl
from jax.experimental.pallas import tpu as pltpu


def _pos_emb_kernel(emb_ref, o_ref):
    # emb_ref: (1, TL)  lane-dense flat slice of the positional table (VMEM).
    # o_ref:   (TB, TL) output block covering TB batch rows.
    # Straight sublane broadcast + store; the kernel body is 100% stores.
    o_ref[...] = jnp.broadcast_to(emb_ref[...], o_ref.shape)


def _choose_tiles(batch, flat_len, itemsize, target_block_bytes):
    """Pick an output block (TB, TL) of roughly target_block_bytes.

    Invariants (keeps Mosaic's (8,128) tiling rule satisfied):
      * TL is a multiple of 128, or TL == flat_len (full last dim).
      * TB is a multiple of 8,   or TB == batch    (full 2nd-to-last dim).
    """
    if batch * flat_len * itemsize <= target_block_bytes:
        return batch, flat_len  # whole output fits in a single block

    if 8 * flat_len * itemsize <= target_block_bytes:
        tl = flat_len  # keep the lane axis whole
    else:
        tl = (target_block_bytes // (8 * itemsize) // 128) * 128
        tl = max(tl, 128)
        tl = min(tl, flat_len)

    tb = (target_block_bytes // (tl * itemsize) // 8) * 8
    tb = max(tb, 8)
    tb = min(tb, batch)
    return tb, tl


def positional_embedding_forward(x, embedding, *, target_block_bytes=4 * 1024 * 1024):
    """Replicates PositionalEmbedding.forward.

    Args:
      x:         (batch, seq, ...) — only its leading two dims are consumed.
      embedding: (n_positions, d_embedding) parameter table.

    Returns:
      (batch, seq, d_embedding) array with dtype of `embedding`.
    """
    batch, seq = x.shape[0], x.shape[1]
    d_emb = embedding.shape[1]
    flat_len = seq * d_emb
    itemsize = jnp.dtype(embedding.dtype).itemsize

    # Lane-dense view of the first `seq` rows of the table: (1, seq*d_emb).
    # Collapsing (seq, d_emb) onto the lane axis keeps stores unmasked even
    # when d_embedding < 128 (the slice/reshape is 1/batch of the output bytes).
    emb_flat = embedding[:seq].reshape(1, flat_len)

    tb, tl = _choose_tiles(batch, flat_len, itemsize, target_block_bytes)
    n_l = pl.cdiv(flat_len, tl)
    n_b = pl.cdiv(batch, tb)

    # The positional table never changes across batch steps; when it also fits
    # in a single lane tile its block index is constant over the whole grid,
    # so one VMEM buffer suffices (skip double-buffering of the input).
    in_spec_kwargs = {}
    if n_l == 1:
        in_spec_kwargs["pipeline_mode"] = pl.Buffered(1)

    out_flat = pl.pallas_call(
        _pos_emb_kernel,
        out_shape=jax.ShapeDtypeStruct((batch, flat_len), embedding.dtype),
        grid_spec=pltpu.PrefetchScalarGridSpec(
            num_scalar_prefetch=0,
            # Lane-tile axis outer, batch-tile axis inner: the input block
            # index changes only n_l times total, so it is rarely re-DMA'd.
            grid=(n_l, n_b),
            in_specs=[
                pl.BlockSpec((1, tl), lambda l, b: (0, l), **in_spec_kwargs),
            ],
            out_specs=pl.BlockSpec((tb, tl), lambda l, b: (b, l)),
        ),
        compiler_params=pltpu.CompilerParams(
            # Both axes are fully independent -> megacore-shardable on v7x.
            dimension_semantics=("parallel", "parallel"),
            # 2x ~4 MiB output buffers + small input buffers; raise scoped
            # VMEM past v5e's 16 MiB default for headroom (fits v7x's 64 MiB).
            vmem_limit_bytes=32 * 1024 * 1024,
        ),
        cost_estimate=pl.CostEstimate(
            flops=0,
            transcendentals=0,
            bytes_accessed=(batch * flat_len + flat_len) * itemsize,
        ),
    )(emb_flat)

    # Free (layout-preserving) reshape back to the PyTorch output layout.
    return out_flat.reshape(batch, seq, d_emb)


def init_positional_embedding(key, n_positions, d_embedding, dtype=jnp.float32):
    """Deterministic xavier_uniform_ init, matching the PyTorch __init__."""
    bound = (6.0 / (n_positions + d_embedding)) ** 0.5
    return jax.random.uniform(
        key, (n_positions, d_embedding), dtype=dtype, minval=-bound, maxval=bound
    )


if __name__ == "__main__":
    key = jax.random.PRNGKey(0)
    k_emb, k_x = jax.random.split(key)

    # Small demo shapes consistent with the module.
    n_positions = 16
    d_embedding = 32
    batch = 2
    seq = 8
    hidden = 32  # trailing feature dim of x (forward only uses x.shape[:2])

    embedding = init_positional_embedding(k_emb, n_positions, d_embedding)
    x = jax.random.normal(k_x, (batch, seq, hidden), dtype=jnp.float32)

    out = positional_embedding_forward(x, embedding)
    out = jax.block_until_ready(out)

    ref = jnp.broadcast_to(embedding[:seq][None, :, :], (batch, seq, d_embedding))
    assert out.shape == (batch, seq, d_embedding), out.shape
    assert out.dtype == embedding.dtype, out.dtype
    assert bool(jnp.all(out == ref)), "mismatch vs reference (small case)"

    # Second case: force the tiled path (multi-step grid, batch-blocked and
    # lane-blocked output blocks) while keeping shapes small, by lowering the
    # per-block byte target.
    batch2, seq2, d_emb2 = 16, 24, 64
    emb2 = init_positional_embedding(k_emb, 32, d_emb2)
    x2 = jnp.zeros((batch2, seq2, 4), dtype=jnp.float32)
    out2 = jax.block_until_ready(
        positional_embedding_forward(x2, emb2, target_block_bytes=16 * 1024)
    )
    ref2 = jnp.broadcast_to(emb2[:seq2][None, :, :], (batch2, seq2, d_emb2))
    assert out2.shape == (batch2, seq2, d_emb2), out2.shape
    assert bool(jnp.all(out2 == ref2)), "mismatch vs reference (tiled case)"

    print("KERNEL_OK")
</pallas_src>

<mosaic_0001>
module attributes {stable_mosaic.version = 11 : i64} {
  func.func @_pos_emb_kernel(%arg0: i32, %arg1: i32, %arg2: memref<1x256xf32, #tpu.memory_space<vmem>>, %arg3: memref<2x256xf32, #tpu.memory_space<vmem>>) attributes {dimension_semantics = [#tpu.dimension_semantics<parallel>, #tpu.dimension_semantics<parallel>], iteration_bounds = array<i64: 1, 1>, scalar_prefetch = 0 : i64, scratch_operands = 0 : i64, tpu.core_type = #tpu.core_type<tc>, window_params = [{pipeline_mode = #tpu.pipeline_mode<synchronous>, transform_indices = @transform_0, window_bounds = array<i64: 1, 256>}, {transform_indices = @transform_1, window_bounds = array<i64: 2, 256>}]} {
    %c0 = arith.constant 0 : index
    %c0_0 = arith.constant 0 : index
    %0 = vector.load %arg2[%c0, %c0_0] : memref<1x256xf32, #tpu.memory_space<vmem>>, vector<1x256xf32>
    %1 = vector.shape_cast %0 : vector<1x256xf32> to vector<1x256xf32>
    %2 = vector.broadcast %1 : vector<1x256xf32> to vector<2x256xf32>
    %c0_1 = arith.constant 0 : index
    %c0_2 = arith.constant 0 : index
    %3 = vector.load %arg3[%c0_1, %c0_2] : memref<2x256xf32, #tpu.memory_space<vmem>>, vector<2x256xf32>
    tpu.vector_store %arg3[%c0_1, %c0_2], %2 {strides = array<i32>} : memref<2x256xf32, #tpu.memory_space<vmem>>, vector<2x256xf32>,
    return
  }
  func.func @transform_0(%arg0: i32, %arg1: i32) -> (i32, i32) {
    %c0_i32 = arith.constant 0 : i32
    %c0_i32_0 = arith.constant 0 : i32
    return %c0_i32, %arg0 : i32, i32
  }
  func.func @transform_1(%arg0: i32, %arg1: i32) -> (i32, i32) {
    %c0_i32 = arith.constant 0 : i32
    return %arg1, %arg0 : i32, i32
  }
}

</mosaic_0001>

<bundles_post_ra>
// kernel: tpu_custom_call.1
= control target key start
LH: loop header
LB: loop body
LE: loop exit
PB: predicated region body
PF: predicated region fallthrough
CT: control target
= control target key end

     0   :  { %6 = vsyncpa [#allocation3], 0  ;;  %s121_s0 = inlined_call_operand.hbm [shape: f32[1,256], index: 0, kind: input, shape index: {}]   ;;  %s122_s1 = inlined_call_operand.hbm [shape: f32[2,256], index: 1, kind: output, shape index: {}]  }
   0x1   :  { %7 = vsyncpa [#allocation4], 0  ;;  %s103_s6 = smov [#allocation2]  }
   0x2   :  { %s14_s7 = sshll.u32 %s103_s6, 4  ;;  %s15_s7 = int_to_ptr.vmem [resolvable:$true] %s14_s7 }
   0x3   :  { %s67_s8 = scalar_lea.vmem %s15_s7, 32  ;;  %p72_p1 = scmp.lt.s32.totalorder %s15_s7, %s15_s7 }
   0x4   :  { %p68_p0 = scmp.ne.s32.totalorder %s15_s7, %s67_s8  ;;  %p73_p2 = scmp.lt.s32.totalorder %s67_s8, %s67_s8 }
   0x6   :  { %p74_p3 = por %p73_p2, %p72_p1 }
   0x8   :  { %p75_p4 = pnand %p74_p3, %p68_p0 }
   0xa   :  { %78 = shalt.err (!%p75_p4)
}
   0xb   :  { %17 = dma.hbm_to_vmem [thread:$0]  %s121_s0, 32, %s15_s7, [#allocation3]  }
   0xc   :  { %99 = dma.done.wait [#allocation3], 32  }
   0xd   :  { %100 = vsyncadd [#allocation3], 4294967264  ;;  %v23_v0 = vlaneseq  ;;  %v21_v4 = vld [vmem:[#allocation2] sm:$0x3]  ;;  %s104_s11 = smov [#allocation5]  }
   0xe   :  { %s47_s12 = sshll.u32 %s104_s11, 4  ;;  %s48_s12 = int_to_ptr.vmem [resolvable:$true] %s47_s12 }
   0xf   :  { %v24_v1 = vshrl.u32 %v23_v0, 7  ;;  %s79_s13 = scalar_lea.vmem %s48_s12, 64  ;;  %p84_p6 = scmp.lt.s32.totalorder %s48_s12, %s48_s12 }
  0x10   :  { %p80_p5 = scmp.ne.s32.totalorder %s48_s12, %s79_s13  ;;  %p85_p7 = scmp.lt.s32.totalorder %s79_s13, %s79_s13 }
  0x11   :  { %v25_v2 = vsub.s32 0, %v24_v1  ;;  %v29_v3 = vsub.s32 1, %v24_v1 }
  0x12   :  { %p86_p8 = por %p85_p7, %p84_p6 }
  0x13   :  { %v26_v5 = vrot.slane %v21_v4, %v25_v2  ;;  %v30_v6 = vrot.slane %v21_v4, %v29_v3 }
  0x14   :  { %p87_p9 = pnand %p86_p8, %p80_p5 }
  0x15   :  { %v31_v7 = vcombine.low %v26_v5, %v30_v6 }
  0x17   :  { %56 = vst.sshfl [vmem:[#allocation5] sm:$0x33 pattern:$0x76325410] %v31_v7 }
  0x18   :  { %90 = shalt.err (!%p87_p9)
}
  0x19   :  { %50 = dma.vmem_to_hbm [thread:$0]  %s48_s12, 64, %s122_s1, [#allocation4]  }
  0x1a   :  { %101 = dma.done.wait [#allocation4], 64  }
  0x1b   :  { %102 = vsyncadd [#allocation4], 4294967232 }
  0x1c   :  { %54 = vsyncpa [#allocation3], 1 }
  0x1d   :  { %55 = vsyncpa [#allocation4], 1 }

</bundles_post_ra>
